<compile_context>
chip_gen: v6e
topology: v6e:2x2x1
jax: 0.10.0
libtpu: 0.0.40
codegen_flags: <defaults>
</compile_context>

<pallas_src>
import jax
import jax.numpy as jnp
from jax.experimental import pallas as pl
from jax.experimental.pallas import tpu as pltpu


def _resnet_kernel(x_ref, scale_ref, bias_ref, last_ref, hid_ref):
    """Fused encoder hot path for one (tile_rows, tile_lanes) slab tile.

    x_ref     : (tr, tl)  input tile, rows = (batch, channel), lanes = H*W
    scale_ref : (tr, 1)   folded BN scale  = gamma / sqrt(var + eps)  (per row)
    bias_ref  : (tr, 1)   folded BN bias   = beta - mean * scale      (per row)
    last_ref  : (tr, tl)  last_hidden_state tile (batch-norm of final layer)
    hid_ref   : (tr, tl)  deduplicated per-layer hidden state tile
    """
    # ReLU once: relu(relu(x)) == relu(x), so every layer's output is this.
    relu_x = jnp.maximum(x_ref[...], 0.0)
    hid_ref[...] = relu_x
    # BatchNorm2d (eval mode) folded to a per-channel affine; the (tr, 1)
    # column broadcasts along the lane (spatial) axis.
    last_ref[...] = relu_x * scale_ref[...] + bias_ref[...]


def _pick_tile(total, cap, quantum):
    """Largest divisor of `total` that is <= cap and a multiple of `quantum`;
    falls back to the full extent (always a legal block size)."""
    best = None
    t = quantum
    limit = min(total, cap)
    while t <= limit:
        if total % t == 0:
            best = t
        t += quantum
    return best if best is not None else total


def resnet_forward(x_nchw, gamma, beta, running_mean, running_var, *,
                   num_layers, eps=0.02, row_tile_cap=512, lane_tile_cap=1024):
    """x_nchw: (B, C, H, W) float32. Returns (last_hidden_state, hidden_states)
    with PyTorch layouts (B, C, H, W) and (L, B, C, H, W)."""
    assert num_layers >= 1, "encoder must have at least one layer"
    B, C, H, W = x_nchw.shape
    R, HW = B * C, H * W

    # Native-layout slab: NCHW -> (B*C, H*W) is a pure reshape (no HBM copy).
    x2d = x_nchw.reshape(R, HW)

    # Fold BatchNorm2d (eval mode) into per-channel scale/bias, replicated per
    # batch so each row of the slab has its own (scale, bias). Tiny arrays.
    inv_std = gamma / jnp.sqrt(running_var + eps)
    scale2d = jnp.tile(inv_std.reshape(C, 1), (B, 1))                    # (R, 1)
    bias2d = jnp.tile((beta - running_mean * inv_std).reshape(C, 1), (B, 1))

    tr = _pick_tile(R, row_tile_cap, 8)      # sublane-axis tile (mult of 8)
    tl = _pick_tile(HW, lane_tile_cap, 128)  # lane-axis tile (mult of 128)
    # Give the megacore at least 2 grid steps along the row axis when legal
    # (v7x has 2 TensorCores per chip).
    if R // tr < 2 and tr % 2 == 0 and (tr // 2) % 8 == 0:
        tr //= 2

    grid = (R // tr, HW // tl)

    last2d, hid2d = pl.pallas_call(
        _resnet_kernel,
        out_shape=(
            jax.ShapeDtypeStruct((R, HW), x2d.dtype),
            jax.ShapeDtypeStruct((R, HW), x2d.dtype),
        ),
        grid_spec=pltpu.PrefetchScalarGridSpec(
            num_scalar_prefetch=0,
            grid=grid,
            in_specs=[
                pl.BlockSpec((tr, tl), lambda i, j: (i, j)),
                pl.BlockSpec((tr, 1), lambda i, j: (i, 0)),
                pl.BlockSpec((tr, 1), lambda i, j: (i, 0)),
            ],
            out_specs=[
                pl.BlockSpec((tr, tl), lambda i, j: (i, j)),
                pl.BlockSpec((tr, tl), lambda i, j: (i, j)),
            ],
        ),
        compiler_params=pltpu.CompilerParams(
            dimension_semantics=("parallel", "parallel"),
            vmem_limit_bytes=32 * 1024 * 1024,
        ),
    )(x2d, scale2d, bias2d)

    # Free reshapes back to PyTorch layouts; the L identical layer outputs are
    # reconstructed by broadcast instead of being written L times by the kernel.
    last_hidden_state = last2d.reshape(B, C, H, W)
    hidden_states = jnp.broadcast_to(
        hid2d.reshape(1, B, C, H, W), (num_layers, B, C, H, W))
    return last_hidden_state, hidden_states


def resnet_reference(x_nchw, gamma, beta, running_mean, running_var, *,
                     num_layers, eps=0.02):
    """Pure-JAX reference of the same semantics (for verification)."""
    x = x_nchw
    outs = []
    for _ in range(num_layers):
        x = jnp.maximum(x, 0.0)
        outs.append(x)
    inv_std = gamma / jnp.sqrt(running_var + eps)
    scale = inv_std.reshape(1, -1, 1, 1)
    bias = (beta - running_mean * inv_std).reshape(1, -1, 1, 1)
    last = x * scale + bias
    return last, jnp.stack(outs, axis=0)


if __name__ == "__main__":
    # Small synthetic shapes: batch=2, num_features(channels)=128, spatial=16
    # (H*W=256, lane-dense), num_layers=4 (module defaults: 768 feats / 12 layers).
    B, C, H, W = 2, 128, 16, 16
    NUM_LAYERS = 4

    key = jax.random.PRNGKey(0)
    kx, kg, kb, km, kv = jax.random.split(key, 5)
    x = jax.random.normal(kx, (B, C, H, W), dtype=jnp.float32)

    # Deterministic BatchNorm2d parameters / running stats.
    gamma = 1.0 + 0.1 * jax.random.normal(kg, (C,), dtype=jnp.float32)
    beta = 0.1 * jax.random.normal(kb, (C,), dtype=jnp.float32)
    running_mean = 0.05 * jax.random.normal(km, (C,), dtype=jnp.float32)
    running_var = 1.0 + 0.1 * jax.random.uniform(kv, (C,), dtype=jnp.float32)

    last, hidden = resnet_forward(
        x, gamma, beta, running_mean, running_var, num_layers=NUM_LAYERS)
    jax.block_until_ready((last, hidden))

    last_ref, hidden_ref = resnet_reference(
        x, gamma, beta, running_mean, running_var, num_layers=NUM_LAYERS)

    assert last.shape == (B, C, H, W)
    assert hidden.shape == (NUM_LAYERS, B, C, H, W)
    assert jnp.allclose(last, last_ref, atol=1e-5, rtol=1e-5)
    assert jnp.allclose(hidden, hidden_ref, atol=1e-5, rtol=1e-5)

    print("KERNEL_OK")
</pallas_src>

<mosaic_0001>
module attributes {stable_mosaic.version = 11 : i64} {
  func.func @_resnet_kernel(%arg0: i32, %arg1: i32, %arg2: memref<128x256xf32, #tpu.memory_space<vmem>>, %arg3: memref<128x1xf32, #tpu.memory_space<vmem>>, %arg4: memref<128x1xf32, #tpu.memory_space<vmem>>, %arg5: memref<128x256xf32, #tpu.memory_space<vmem>>, %arg6: memref<128x256xf32, #tpu.memory_space<vmem>>) attributes {dimension_semantics = [#tpu.dimension_semantics<parallel>, #tpu.dimension_semantics<parallel>], iteration_bounds = array<i64: 2, 1>, scalar_prefetch = 0 : i64, scratch_operands = 0 : i64, tpu.core_type = #tpu.core_type<tc>, window_params = [{transform_indices = @transform_0, window_bounds = array<i64: 128, 256>}, {transform_indices = @transform_1, window_bounds = array<i64: 128, 1>}, {transform_indices = @transform_2, window_bounds = array<i64: 128, 1>}, {transform_indices = @transform_3, window_bounds = array<i64: 128, 256>}, {transform_indices = @transform_4, window_bounds = array<i64: 128, 256>}]} {
    %c0 = arith.constant 0 : index
    %c0_0 = arith.constant 0 : index
    %0 = vector.load %arg2[%c0, %c0_0] : memref<128x256xf32, #tpu.memory_space<vmem>>, vector<128x256xf32>
    %cst = arith.constant 0.000000e+00 : f32
    %1 = vector.broadcast %cst : f32 to vector<128x256xf32>
    %2 = arith.maximumf %0, %1 : vector<128x256xf32>
    %c0_1 = arith.constant 0 : index
    %c0_2 = arith.constant 0 : index
    %3 = vector.load %arg6[%c0_1, %c0_2] : memref<128x256xf32, #tpu.memory_space<vmem>>, vector<128x256xf32>
    tpu.vector_store %arg6[%c0_1, %c0_2], %2 {strides = array<i32>} : memref<128x256xf32, #tpu.memory_space<vmem>>, vector<128x256xf32>,
    %c0_3 = arith.constant 0 : index
    %c0_4 = arith.constant 0 : index
    %4 = vector.load %arg3[%c0_3, %c0_4] : memref<128x1xf32, #tpu.memory_space<vmem>>, vector<128x1xf32>
    %5 = vector.broadcast %4 : vector<128x1xf32> to vector<128x256xf32>
    %6 = arith.mulf %2, %5 : vector<128x256xf32>
    %c0_5 = arith.constant 0 : index
    %c0_6 = arith.constant 0 : index
    %7 = vector.load %arg4[%c0_5, %c0_6] : memref<128x1xf32, #tpu.memory_space<vmem>>, vector<128x1xf32>
    %8 = vector.broadcast %7 : vector<128x1xf32> to vector<128x256xf32>
    %9 = arith.addf %6, %8 : vector<128x256xf32>
    %c0_7 = arith.constant 0 : index
    %c0_8 = arith.constant 0 : index
    %10 = vector.load %arg5[%c0_7, %c0_8] : memref<128x256xf32, #tpu.memory_space<vmem>>, vector<128x256xf32>
    tpu.vector_store %arg5[%c0_7, %c0_8], %9 {strides = array<i32>} : memref<128x256xf32, #tpu.memory_space<vmem>>, vector<128x256xf32>,
    return
  }
  func.func @transform_0(%arg0: i32, %arg1: i32) -> (i32, i32) {
    %c0_i32 = arith.constant 0 : i32
    return %arg0, %arg1 : i32, i32
  }
  func.func @transform_1(%arg0: i32, %arg1: i32) -> (i32, i32) {
    %c0_i32 = arith.constant 0 : i32
    %c0_i32_0 = arith.constant 0 : i32
    return %arg0, %c0_i32 : i32, i32
  }
  func.func @transform_2(%arg0: i32, %arg1: i32) -> (i32, i32) {
    %c0_i32 = arith.constant 0 : i32
    %c0_i32_0 = arith.constant 0 : i32
    return %arg0, %c0_i32 : i32, i32
  }
  func.func @transform_3(%arg0: i32, %arg1: i32) -> (i32, i32) {
    %c0_i32 = arith.constant 0 : i32
    return %arg0, %arg1 : i32, i32
  }
  func.func @transform_4(%arg0: i32, %arg1: i32) -> (i32, i32) {
    %c0_i32 = arith.constant 0 : i32
    return %arg0, %arg1 : i32, i32
  }
}

</mosaic_0001>

<bundles_post_ra>
// kernel: tpu_custom_call.1
= control target key start
LH: loop header
LB: loop body
LE: loop exit
PB: predicated region body
PF: predicated region fallthrough
CT: control target
= control target key end

     0   :  { %10 = vsyncpa [#allocation3], 0  ;;  %s1651_s0 = inlined_call_operand.vmem [shape: f32[256,256], index: 0, kind: input, shape index: {}]   ;;  %s1652_s1 = inlined_call_operand.vmem [shape: f32[256,1], index: 1, kind: input, shape index: {}]   ;;  %s1653_s2 = inlined_call_operand.vmem [shape: f32[256,1], index: 2, kind: input, shape index: {}]   ;;  %s1654_s3 = inlined_call_operand.hbm [shape: f32[256,256], index: 3, kind: output, shape index: {0}]   ;;  %s1655_s4 = inlined_call_operand.hbm [shape: f32[256,256], index: 4, kind: output, shape index: {1}]  }
   0x1   :  { %12 = vsyncpa [#allocation3 + $0x1], 0 }
   0x2   :  { %13 = vsyncpa [#allocation5], 0 }
   0x3   :  { %15 = vsyncpa [#allocation5 + $0x1], 0  ;;  %s1087_s15 = smov 0   ;;  %s1089_s16 = smov 0  }
   0x4   :  { %s1091_s17 = smov 0   ;;  %s1093_s18 = smov 0  }
   0x5   :  { %s1095_s19 = smov 0   ;;  %s1097_s20 = smov 0  }
   0x6 LB: > { %s855_s21 = sadd.s32 4294967295, %s1055_s20   ;;  %s856_s22 = sadd.s32 4294967294, %s1055_s20   ;;  %s1055_s20 = sphi %s1097_s20, %s21_s20   ;;  %s1051_s19 = sphi %s1095_s19, %s1716_s19   ;;  %s1047_s18 = sphi %s1093_s18, %s1715_s18   ;;  %s1043_s17 = sphi %s1091_s17, %s1714_s17   ;;  %s1039_s16 = sphi %s1089_s16, %s1713_s16   ;;  %s1035_s15 = sphi %s1087_s15, %s1712_s15  }
   0x7   : > { %s33_s23 = sadd.s32 1, %s1051_s19  ;;  %s122_s24 = sadd.s32 1, %s1043_s17 }
   0x8   : > { %p35_p0 = scmp.ge.s32.totalorder %s33_s23, 2  ;;  %p132_p1 = scmp.ne.s32.totalorder %s1043_s17, %s1039_s16 }
   0x9   : > { %p133_p2 = scmp.eq.s32.totalorder %s855_s21, 1  ;;  %p138_p3 = scmp.ne.s32.totalorder %s1039_s16, %s1035_s15 }
   0xa   : > { %s1718_s23 = smov (%p35_p0, %s33_s23), 0  ;;  %p139_p5 = scmp.eq.s32.totalorder %s856_s22, 1 }
   0xb   : > { %p1127_p4 = por %p133_p2, %p132_p1  ;;  %s117_s26 = ssub.s32 %s1051_s19, %s1718_s23 }
   0xc   : > { %p859_p6 = scmp.ge.s32.totalorder %s1055_s20, 1  ;;  %p120_p7 = scmp.eq.s32.totalorder %s117_s26, 0 }
   0xd   : > { %p1134_p8 = por %p139_p5, %p138_p3  ;;  %p218_p9 = scmp.lt.s32.totalorder %s1055_s20, 3 }
   0xe   : > { %s1140_s28 = scalar_select %p120_p7, %s1043_s17, %s122_s24  }
   0xf   : > { %p219_p10 = pnand %p859_p6, %p218_p9 }
  0x10   : > { %s862_s29 = sshll.u32 (!%p219_p10), %s1047_s18, 4  ;;  %s1161_s9 = sand.u32 (!%p219_p10), 1, %s1039_s16  }
  0x11   : > { %222 = sbr.rel (%p219_p10) target bundleno = 226 (0xe2), region = 32  ;;  %p266_p11 = scmp.lt.s32.totalorder (!%p219_p10), %s862_s29, 31 }
  0x12   : > { %s860_s13 = sshll.u32 (!%p219_p10), %s1161_s9, 8  ;;  %s881_s26 = sshll.u32 (!%p219_p10), %s1047_s18, 12 }
  0x13   : > { %s1200_s14 = scalar_lea.vmem (!%p219_p10), [#allocation4], %s860_s13  ;;  %s1436_s5 = scalar_lea.hbm (!%p219_p10), %s1655_s4, %s881_s26 }
  0x14   : > { %s717_s6 = sshll.u32 (!%p219_p10), %s1200_s14, 4  ;;  %s1058_s10 = smov (!%p219_p10), [#allocation4]   ;;  %s1439_s6 = int_to_ptr.vmem [resolvable:$true] %s717_s6 }
  0x15   : > { %s953_s11 = sshll.u32 (!%p219_p10), %s1058_s10, 4  ;;  %s954_s11 = int_to_ptr.vmem [resolvable:$false] %s953_s11 }
  0x16   : > { %v1057_v0 = vmov 0   ;;  %s1720_s29 = smov (!%p266_p11, %s862_s29), 31  ;;  %p956_p1 = scmp.lt.s32.totalorder %s1439_s6, %s954_s11 }
  0x17   : > { %948 = vset.pattern.permute.xlu1 %v1057_v0  ;;  %947 = vset.pattern.permute.xlu0 %v1057_v0  ;;  %s866_s30 = sshll.u32 %s1720_s29, 3  ;;  %s879_s8 = sshll.u32 %s1720_s29, 4 }
  0x18   : > { %s1151_s7 = scalar_lea.vmem %s1652_s1, %s866_s30  ;;  %s1166_s12 = scalar_lea.vmem %s1651_s0, %s879_s8 }
  0x19   : > { %v390_v1 = vld [vmem:[%s1151_s7 + $0x10] sm:$0xff]  ;;  %v388_v2 = vld [vmem:[%s1151_s7] sm:$0xff]  ;;  %v391_v3 = vld [vmem:[%s1151_s7 + $0x18] sm:$0xff]  ;;  %s1412_s24 = scalar_lea.vmem %s1653_s2, %s866_s30  ;;  %s949_s8 = scalar_lea.vmem %s1439_s6, 4096 }
  0x1a   : > { %416 = vperm.xlu1 %948, %v390_v1   ;;  %406 = vperm.xlu0 %947, %v388_v2   ;;  %v389_v4 = vld [vmem:[%s1151_s7 + $0x8] sm:$0xff]  ;;  %v392_v6 = vld [vmem:[%s1151_s7 + $0x20] sm:$0xff]  ;;  %v395_v7 = vld [vmem:[%s1151_s7 + $0x38] sm:$0xff]  ;;  %p950_p12 = scmp.ne.s32.totalorder %s1439_s6, %s949_s8 }
  0x1b   : > { %v393_v5 = vld [vmem:[%s1151_s7 + $0x28] sm:$0xff]  ;;  %v394_v8 = vld [vmem:[%s1151_s7 + $0x30] sm:$0xff]  ;;  %v1172_v9 = vld [vmem:[%s1166_s12 + $0x20] sm:$0xff] }
  0x1c   : > { %v1175_v10 = vld [vmem:[%s1166_s12 + $0x28] sm:$0xff]  ;;  %v328_v11 = vmax.f32 %v1172_v9, 0.0  ;;  %v1179_v12 = vld [vmem:[%s1166_s12] sm:$0xff]  ;;  %v1190_v19 = vld [vmem:[%s1166_s12 + $0x30] sm:$0xff]  ;;  %p951_p13 = pnand %p950_p12, %p1127_p4 }
  0x1d   : > { %v1182_v13 = vld [vmem:[%s1166_s12 + $0x8] sm:$0xff]  ;;  %v396_v15 = vld [vmem:[%s1151_s7 + $0x40] sm:$0xff]  ;;  %v1682_v16 = vmax.f32 %v1175_v10, 0.0  ;;  %v324_v17 = vmax.f32 %v1179_v12, 0.0  ;;  %v1193_v20 = vld [vmem:[%s1166_s12 + $0x38] sm:$0xff]  ;;  %v1681_v22 = vmax.f32 %v1190_v19, 0.0 }
  0x1e   : > { %421 = vperm.xlu1 %948, %v391_v3   ;;  %411 = vperm.xlu0 %947, %v389_v4   ;;  %v397_v14 = vld [vmem:[%s1151_s7 + $0x48] sm:$0xff]  ;;  %v325_v18 = vmax.f32 %v1182_v13, 0.0  ;;  %v1196_v21 = vld [vmem:[%s1166_s12 + $0x10] sm:$0xff]  ;;  %360 = vst [vmem:[%s1200_s14 + $0x20] sm:$0xff] %v328_v11  ;;  %v1680_v23 = vmax.f32 %v1193_v20, 0.0  ;;  %v1208_v24 = vld [vmem:[%s1166_s12 + $0x18] sm:$0xff]  ;;  %p952_p0 = pneg %p951_p13 }
  0x1f   : > { %v326_v25 = vmax.f32 %v1196_v21, 0.0  ;;  %v1212_v26 = vld [vmem:[%s1166_s12 + $0x50] sm:$0xff]  ;;  %v1215_v27 = vld [vmem:[%s1166_s12 + $0x58] sm:$0xff]  ;;  %361 = vst [vmem:[%s1200_s14 + $0x28] sm:$0xff] %v1682_v16  ;;  %356 = vst [vmem:[%s1200_s14] sm:$0xff] %v324_v17  ;;  %v327_v28 = vmax.f32 %v1208_v24, 0.0 }
  0x20   : > { %357 = vst [vmem:[%s1200_s14 + $0x8] sm:$0xff] %v325_v18  ;;  %v1679_v29 = vmax.f32 %v1212_v26, 0.0  ;;  %v1678_v30 = vmax.f32 %v1215_v27, 0.0  ;;  %v1230_v31 = vld [vmem:[%s1166_s12 + $0x40] sm:$0xff]  ;;  %v1233_v32 = vld [vmem:[%s1166_s12 + $0x48] sm:$0xff]  ;;  %v1236_v33 = vld [vmem:[%s1166_s12 + $0x70] sm:$0xff] }
  0x21   : > { %362 = vst [vmem:[%s1200_s14 + $0x30] sm:$0xff] %v1681_v22  ;;  %363 = vst [vmem:[%s1200_s14 + $0x38] sm:$0xff] %v1680_v23  ;;  %v1677_v34 = vmax.f32 %v1230_v31, 0.0  ;;  %v1676_v35 = vmax.f32 %v1233_v32, 0.0  ;;  %v1250_v36 = vld [vmem:[%s1166_s12 + $0x78] sm:$0xff]  ;;  %v1675_v37 = vmax.f32 %v1236_v33, 0.0 }
  0x22   : > { %431 = vperm.xlu1 %948, %v393_v5   ;;  %426 = vperm.xlu0 %947, %v392_v6   ;;  %358 = vst [vmem:[%s1200_s14 + $0x10] sm:$0xff] %v326_v25  ;;  %v1254_v38 = vld [vmem:[%s1166_s12 + $0x60] sm:$0xff]  ;;  %v1257_v39 = vld [vmem:[%s1166_s12 + $0x68] sm:$0xff]  ;;  %v399_v40 = vld [vmem:[%s1151_s7 + $0x58] sm:$0xff]  ;;  %v1674_v42 = vmax.f32 %v1250_v36, 0.0 }
  0x23   : > { %v398_v41 = vld [vmem:[%s1151_s7 + $0x50] sm:$0xff]  ;;  %359 = vst [vmem:[%s1200_s14 + $0x18] sm:$0xff] %v327_v28  ;;  %366 = vst [vmem:[%s1200_s14 + $0x50] sm:$0xff] %v1679_v29  ;;  %v1673_v43 = vmax.f32 %v1254_v38, 0.0  ;;  %v1672_v44 = vmax.f32 %v1257_v39, 0.0  ;;  %v1277_v46 = vld [vmem:[%s1166_s12 + $0x98] sm:$0xff] }
  0x24   : > { %367 = vst [vmem:[%s1200_s14 + $0x58] sm:$0xff] %v1678_v30  ;;  %v1274_v45 = vld [vmem:[%s1166_s12 + $0x90] sm:$0xff]  ;;  %v1280_v47 = vld [vmem:[%s1166_s12 + $0x80] sm:$0xff]  ;;  %364 = vst [vmem:[%s1200_s14 + $0x40] sm:$0xff] %v1677_v34  ;;  %v1670_v49 = vmax.f32 %v1277_v46, 0.0 }
  0x25   : > { %365 = vst [vmem:[%s1200_s14 + $0x48] sm:$0xff] %v1676_v35  ;;  %370 = vst [vmem:[%s1200_s14 + $0x70] sm:$0xff] %v1675_v37  ;;  %v1671_v48 = vmax.f32 %v1274_v45, 0.0  ;;  %v1294_v50 = vld [vmem:[%s1166_s12 + $0x88] sm:$0xff]  ;;  %v1669_v51 = vmax.f32 %v1280_v47, 0.0  ;;  %v1298_v52 = vld [vmem:[%s1166_s12 + $0xb0] sm:$0xff] }
  0x26   : > { %441 = vperm.xlu1 %948, %v395_v7   ;;  %436 = vperm.xlu0 %947, %v394_v8   ;;  %v1301_v53 = vld [vmem:[%s1166_s12 + $0xb8] sm:$0xff]  ;;  %371 = vst [vmem:[%s1200_s14 + $0x78] sm:$0xff] %v1674_v42  ;;  %368 = vst [vmem:[%s1200_s14 + $0x60] sm:$0xff] %v1673_v43  ;;  %v1668_v54 = vmax.f32 %v1294_v50, 0.0  ;;  %v1667_v55 = vmax.f32 %v1298_v52, 0.0  ;;  %v1316_v57 = vld [vmem:[%s1166_s12 + $0xa0] sm:$0xff] }
  0x27   : > { %369 = vst [vmem:[%s1200_s14 + $0x68] sm:$0xff] %v1672_v44  ;;  %v1666_v56 = vmax.f32 %v1301_v53, 0.0  ;;  %v1319_v58 = vld [vmem:[%s1166_s12 + $0xa8] sm:$0xff]  ;;  %v1322_v59 = vld [vmem:[%s1166_s12 + $0xd0] sm:$0xff]  ;;  %374 = vst [vmem:[%s1200_s14 + $0x90] sm:$0xff] %v1671_v48  ;;  %v1665_v60 = vmax.f32 %v1316_v57, 0.0 }
  0x28   : > { %375 = vst [vmem:[%s1200_s14 + $0x98] sm:$0xff] %v1670_v49  ;;  %372 = vst [vmem:[%s1200_s14 + $0x80] sm:$0xff] %v1669_v51  ;;  %v1664_v61 = vmax.f32 %v1319_v58, 0.0  ;;  %v1336_v62 = vld [vmem:[%s1166_s12 + $0xd8] sm:$0xff]  ;;  %v1659_v63 = vmax.f32 %v1322_v59, 0.0  ;;  %v1340_v0 = vld [vmem:[%s1166_s12 + $0xc0] sm:$0xff] }
  0x29   : > { %v1343_v1 = vld [vmem:[%s1166_s12 + $0xc8] sm:$0xff]  ;;  %373 = vst [vmem:[%s1200_s14 + $0x88] sm:$0xff] %v1668_v54  ;;  %378 = vst [vmem:[%s1200_s14 + $0xb0] sm:$0xff] %v1667_v55  ;;  %v1657_v2 = vmax.f32 %v1336_v62, 0.0  ;;  %v1656_v3 = vmax.f32 %v1340_v0, 0.0  ;;  %v400_v6 = vld [vmem:[%s1151_s7 + $0x60] sm:$0xff] }
  0x2a   : > { %451 = vperm.xlu1 %948, %v397_v14   ;;  %446 = vperm.xlu0 %947, %v396_v15   ;;  %379 = vst [vmem:[%s1200_s14 + $0xb8] sm:$0xff] %v1666_v56  ;;  %v1658_v4 = vmax.f32 %v1343_v1, 0.0  ;;  %v401_v5 = vld [vmem:[%s1151_s7 + $0x68] sm:$0xff]  ;;  %376 = vst [vmem:[%s1200_s14 + $0xa0] sm:$0xff] %v1665_v60  ;;  %v1378_v7 = vld [vmem:[%s1166_s12 + $0xf0] sm:$0xff] }
  0x2b   : > { %377 = vst [vmem:[%s1200_s14 + $0xa8] sm:$0xff] %v1664_v61  ;;  %382 = vst [vmem:[%s1200_s14 + $0xd0] sm:$0xff] %v1659_v63  ;;  %v1381_v8 = vld [vmem:[%s1166_s12 + $0xf8] sm:$0xff]  ;;  %v1384_v14 = vld [vmem:[%s1166_s12 + $0xe0] sm:$0xff]  ;;  %v1663_v15 = vmax.f32 %v1378_v7, 0.0 }
  0x2c   : > { %383 = vst [vmem:[%s1200_s14 + $0xd8] sm:$0xff] %v1657_v2  ;;  %380 = vst [vmem:[%s1200_s14 + $0xc0] sm:$0xff] %v1656_v3  ;;  %v1661_v3 = vmax.f32 %v1384_v14, 0.0  ;;  %v402_v63 = vld [vmem:[%s1151_s7 + $0x70] sm:$0xff]  ;;  %v531_v61 = vld [vmem:[%s1412_s24 + $0x78] sm:$0xff] }
  0x2d   : > { %381 = vst [vmem:[%s1200_s14 + $0xc8] sm:$0xff] %v1658_v4  ;;  %386 = vst [vmem:[%s1200_s14 + $0xf0] sm:$0xff] %v1663_v15  ;;  %v403_v4 = vld [vmem:[%s1151_s7 + $0x78] sm:$0xff]  ;;  %v520_v15 = vld [vmem:[%s1412_s24 + $0x20] sm:$0xff]  ;;  %s682_s7 = scalar_lea.sflag [#allocation5], %s1161_s9 }
  0x2e   : > { %461 = vperm.xlu1 %948, %v399_v40   ;;  %456 = vperm.xlu0 %947, %v398_v41   ;;  %v1662_v40 = vmax.f32 %v1381_v8, 0.0  ;;  %v1389_v41 = vld [vmem:[%s1166_s12 + $0xe8] sm:$0xff]  ;;  %384 = vst [vmem:[%s1200_s14 + $0xe0] sm:$0xff] %v1661_v3  ;;  %v518_v3 = vld [vmem:[%s1412_s24 + $0x10] sm:$0xff]  ;;  %s955_s12 = scalar_lea.vmem %s954_s11, 8192 }
  0x2f   : > { %v1660_v2 = vmax.f32 %v1389_v41, 0.0  ;;  %p957_p2 = scmp.lt.s32.totalorder %s955_s12, %s949_s8 }
  0x30   : > { %387 = vst [vmem:[%s1200_s14 + $0xf8] sm:$0xff] %v1662_v40  ;;  %v521_v40 = vld [vmem:[%s1412_s24 + $0x28] sm:$0xff] }
  0x31   : > { %385 = vst [vmem:[%s1200_s14 + $0xe8] sm:$0xff] %v1660_v2  ;;  %v519_v2 = vld [vmem:[%s1412_s24 + $0x18] sm:$0xff]  ;;  %p958_p3 = por %p957_p2, %p956_p1 }
  0x32   : > { %471 = vperm.xlu1 %948, %v401_v5   ;;  %466 = vperm.xlu0 %947, %v400_v6   ;;  %v517_v5 = vld [vmem:[%s1412_s24 + $0x8] sm:$0xff]  ;;  %v516_v6 = vld [vmem:[%s1412_s24] sm:$0xff] }
  0x33   : > { %p959_p5 = pnand %p958_p3, %p952_p0 }
  0x36   : > { %481 = vperm.xlu1 %948, %v403_v4   ;;  %476 = vperm.xlu0 %947, %v402_v63   ;;  %v523_v4 = vld [vmem:[%s1412_s24 + $0x38] sm:$0xff]  ;;  %v522_v63 = vld [vmem:[%s1412_s24 + $0x30] sm:$0xff] }
  0x3a   : > { %539 = vperm.xlu1 %948, %v517_v5   ;;  %534 = vperm.xlu0 %947, %v516_v6   ;;  %v525_v5 = vld [vmem:[%s1412_s24 + $0x48] sm:$0xff]  ;;  %v524_v6 = vld [vmem:[%s1412_s24 + $0x40] sm:$0xff] }
  0x3e   : > { %549 = vperm.xlu1 %948, %v519_v2   ;;  %544 = vperm.xlu0 %947, %v518_v3   ;;  %v527_v2 = vld [vmem:[%s1412_s24 + $0x58] sm:$0xff]  ;;  %v526_v3 = vld [vmem:[%s1412_s24 + $0x50] sm:$0xff] }
  0x42   : > { %559 = vperm.xlu1 %948, %v521_v40   ;;  %554 = vperm.xlu0 %947, %v520_v15   ;;  %v529_v15 = vld [vmem:[%s1412_s24 + $0x68] sm:$0xff]  ;;  %v528_v40 = vld [vmem:[%s1412_s24 + $0x60] sm:$0xff] }
  0x46   : > { %569 = vperm.xlu1 %948, %v523_v4   ;;  %564 = vperm.xlu0 %947, %v522_v63   ;;  %v530_v4 = vld [vmem:[%s1412_s24 + $0x70] sm:$0xff] }
  0x4a   : > { %579 = vperm.xlu1 %948, %v525_v5   ;;  %574 = vperm.xlu0 %947, %v524_v6  }
  0x4e   : > { %589 = vperm.xlu1 %948, %v527_v2   ;;  %584 = vperm.xlu0 %947, %v526_v3  }
  0x52   : > { %599 = vperm.xlu1 %948, %v529_v15   ;;  %594 = vperm.xlu0 %947, %v528_v40  }
  0x56   : > { %609 = vperm.xlu1 %948, %v531_v61   ;;  %604 = vperm.xlu0 %947, %v530_v4  }
  0x57   : > { %962 = shalt.err (!%p959_p5)
}
  0x58   : > { %s963_s14 = scalar_lea.hbm %s1436_s5, 4096  ;;  %s967_s24 = scalar_lea.hbm %s1655_s4, 8192 }
  0x59   : > { %p964_p6 = scmp.ne.s32.totalorder %s1436_s5, %s963_s14  ;;  %p968_p10 = scmp.lt.s32.totalorder %s1436_s5, %s1655_s4 }
  0x5a   : > { %p969_p11 = scmp.lt.s32.totalorder %s967_s24, %s963_s14 }
  0x5b   : > { %p965_p7 = pnand %p964_p6, %p1127_p4 }
  0x5c   : > { %p970_p12 = por %p969_p11, %p968_p10 }
  0x5d   : > { %p966_p9 = pneg %p965_p7 }
  0x5f   : > { %p971_p13 = pnand %p970_p12, %p966_p9 }
  0x61   : > { %974 = shalt.err (!%p971_p13)
}
  0x62   : > { %s1059_s8 = smov 256   ;;  %s1060_s10 = smov 16   ;;  %v1685_v12 = vmax.f32 %v1175_v10, 0.0  ;;  %v1686_v13 = vmax.f32 %v1190_v19, 0.0  ;;  %v1687_v21 = vmax.f32 %v1193_v20, 0.0 }
  0x63   : > { %885 = dma.vmem_to_hbm [thread:$0]  (%p1127_p4), %s1439_s6, 4096, %s1436_s5, %s682_s7, %s1059_s8, %s1059_s8, %s1060_s10  }
  0x64   : > { %s1499_s5 = scalar_lea.vmem [#allocation2], %s860_s13  ;;  %s1597_s11 = scalar_lea.hbm %s1654_s3, %s881_s26 }
  0x65   : > { %s698_s13 = sshll.u32 %s1499_s5, 4  ;;  %s677_s12 = scalar_lea.sflag [#allocation3], %s1161_s9  ;;  %s1599_s13 = int_to_ptr.vmem [resolvable:$true] %s698_s13 }
  0x66   : > { %s975_s14 = scalar_lea.vmem %s1599_s13, 4096  ;;  %s1061_s18 = smov [#allocation2]  }
  0x67   : > { %p976_p0 = scmp.ne.s32.totalorder %s1599_s13, %s975_s14  ;;  %s979_s21 = sshll.u32 %s1061_s18, 4  ;;  %s980_s21 = int_to_ptr.vmem [resolvable:$false] %s979_s21 }
  0x68   : > { %s981_s26 = scalar_lea.vmem %s980_s21, 8192  ;;  %p982_p3 = scmp.lt.s32.totalorder %s1599_s13, %s980_s21 }
  0x69   : > { %p977_p1 = pnand %p976_p0, %p1127_p4  ;;  %p983_p5 = scmp.lt.s32.totalorder %s981_s26, %s975_s14 }
  0x6b   : > { %p978_p2 = pneg %p977_p1  ;;  %p984_p6 = por %p983_p5, %p982_p3 }
  0x6d   : > { %p985_p7 = pnand %p984_p6, %p978_p2 }
  0x95   : > { %v417_v61 = vpop.permute.xlu1 %416  ;;  %v407_v63 = vpop.permute.xlu0 %406 }
  0x96   : > { %v484_v44 = vmul.f32 %v407_v63, %v324_v17  ;;  %v485_v43 = vmul.f32 %v407_v63, %v325_v18  ;;  %v488_v16 = vmul.f32 %v417_v61, %v328_v11  ;;  %v489_v17 = vmul.f32 %v417_v61, %v1685_v12 }
  0x99   : > { %v422_v5 = vpop.permute.xlu1 %421  ;;  %v412_v6 = vpop.permute.xlu0 %411 }
  0x9a   : > { %v486_v42 = vmul.f32 %v412_v6, %v326_v25  ;;  %v487_v37 = vmul.f32 %v412_v6, %v327_v28  ;;  %v490_v18 = vmul.f32 %v422_v5, %v1686_v13  ;;  %v491_v25 = vmul.f32 %v422_v5, %v1687_v21 }
  0x9b   : > { %v1688_v28 = vmax.f32 %v1212_v26, 0.0  ;;  %v1694_v5 = vmax.f32 %v1254_v38, 0.0  ;;  %v1696_v38 = vmax.f32 %v1274_v45, 0.0 }
  0x9d   : > { %v432_v2 = vpop.permute.xlu1 %431  ;;  %v427_v3 = vpop.permute.xlu0 %426 }
  0xa1   : > { %v442_v15 = vpop.permute.xlu1 %441  ;;  %v437_v40 = vpop.permute.xlu0 %436 }
  0xa2   : > { %v496_v6 = vmul.f32 %v437_v40, %v1694_v5  ;;  %v1711_v5 = vmax.f32 %v1389_v41, 0.0 }
  0xa5   : > { %v452_v4 = vpop.permute.xlu1 %451  ;;  %v1467_v60 = vpop.permute.xlu0 %446 }
  0xa9   : > { %v1469_v56 = vpop.permute.xlu1 %461  ;;  %v1471_v55 = vpop.permute.xlu0 %456 }
  0xad   : > { %v1473_v54 = vpop.permute.xlu1 %471  ;;  %v1475_v51 = vpop.permute.xlu0 %466 }
  0xb1   : > { %v1477_v49 = vpop.permute.xlu1 %481  ;;  %v1479_v48 = vpop.permute.xlu0 %476 }
  0xb5   : > { %v540_v35 = vpop.permute.xlu1 %539  ;;  %v535_v34 = vpop.permute.xlu0 %534 }
  0xb6   : > { %v614_v30 = vadd.f32 %v540_v35, %v486_v42  ;;  %v615_v29 = vadd.f32 %v540_v35, %v487_v37  ;;  %v612_v23 = vadd.f32 %v535_v34, %v484_v44  ;;  %v613_v22 = vadd.f32 %v535_v34, %v485_v43 }
  0xb7   : > { %v494_v34 = vmul.f32 %v432_v2, %v1688_v28  ;;  %v1689_v35 = vmax.f32 %v1215_v27, 0.0  ;;  %v1690_v42 = vmax.f32 %v1230_v31, 0.0  ;;  %v1692_v31 = vmax.f32 %v1236_v33, 0.0 }
  0xb8   : > { %646 = vst [vmem:[%s1499_s5 + $0x10] sm:$0xff] %v614_v30  ;;  %647 = vst [vmem:[%s1499_s5 + $0x18] sm:$0xff] %v615_v29  ;;  %v1691_v29 = vmax.f32 %v1233_v32, 0.0  ;;  %v1693_v32 = vmax.f32 %v1250_v36, 0.0  ;;  %v1702_v28 = vmax.f32 %v1316_v57, 0.0 }
  0xb9   : > { %644 = vst [vmem:[%s1499_s5] sm:$0xff] %v612_v23  ;;  %645 = vst [vmem:[%s1499_s5 + $0x8] sm:$0xff] %v613_v22  ;;  %v550_v9 = vpop.permute.xlu1 %549  ;;  %v545_v10 = vpop.permute.xlu0 %544  ;;  %v495_v37 = vmul.f32 %v432_v2, %v1689_v35  ;;  %v492_v30 = vmul.f32 %v427_v3, %v1690_v42  ;;  %v498_v61 = vmul.f32 %v442_v15, %v1692_v31  ;;  %v1695_v2 = vmax.f32 %v1257_v39, 0.0 }
  0xba   : > { %v618_v11 = vadd.f32 %v550_v9, %v490_v18  ;;  %v619_v19 = vadd.f32 %v550_v9, %v491_v25  ;;  %v616_v20 = vadd.f32 %v545_v10, %v488_v16  ;;  %v617_v24 = vadd.f32 %v545_v10, %v489_v17 }
  0xbb   : > { %v493_v23 = vmul.f32 %v427_v3, %v1691_v29  ;;  %v499_v63 = vmul.f32 %v442_v15, %v1693_v32  ;;  %v497_v3 = vmul.f32 %v437_v40, %v1695_v2  ;;  %v502_v18 = vmul.f32 %v452_v4, %v1696_v38 }
  0xbc   : > { %650 = vst [vmem:[%s1499_s5 + $0x30] sm:$0xff] %v618_v11  ;;  %651 = vst [vmem:[%s1499_s5 + $0x38] sm:$0xff] %v619_v19  ;;  %v1697_v39 = vmax.f32 %v1277_v46, 0.0  ;;  %v1698_v40 = vmax.f32 %v1280_v47, 0.0  ;;  %v1699_v9 = vmax.f32 %v1294_v50, 0.0  ;;  %v1703_v35 = vmax.f32 %v1319_v58, 0.0 }
  0xbd   : > { %648 = vst [vmem:[%s1499_s5 + $0x20] sm:$0xff] %v616_v20  ;;  %649 = vst [vmem:[%s1499_s5 + $0x28] sm:$0xff] %v617_v24  ;;  %v560_v16 = vpop.permute.xlu1 %559  ;;  %v555_v22 = vpop.permute.xlu0 %554  ;;  %v1700_v20 = vmax.f32 %v1298_v52, 0.0  ;;  %v1701_v24 = vmax.f32 %v1301_v53, 0.0  ;;  %v1704_v29 = vmax.f32 %v1322_v59, 0.0  ;;  %v1709_v31 = vmax.f32 %v1381_v8, 0.0 }
  0xbe   : > { %v622_v26 = vadd.f32 %v560_v16, %v494_v34  ;;  %v623_v43 = vadd.f32 %v560_v16, %v495_v37  ;;  %v620_v27 = vadd.f32 %v555_v22, %v492_v30  ;;  %v621_v44 = vadd.f32 %v555_v22, %v493_v23 }
  0xbf   : > { %v503_v21 = vmul.f32 %v452_v4, %v1697_v39  ;;  %v500_v25 = vmul.f32 %v1467_v60, %v1698_v40  ;;  %v501_v10 = vmul.f32 %v1467_v60, %v1699_v9  ;;  %v506_v50 = vmul.f32 %v1469_v56, %v1700_v20 }
  0xc0   : > { %654 = vst [vmem:[%s1499_s5 + $0x50] sm:$0xff] %v622_v26  ;;  %655 = vst [vmem:[%s1499_s5 + $0x58] sm:$0xff] %v623_v43  ;;  %v507_v60 = vmul.f32 %v1469_v56, %v1701_v24  ;;  %v504_v34 = vmul.f32 %v1471_v55, %v1702_v28  ;;  %v505_v37 = vmul.f32 %v1471_v55, %v1703_v35  ;;  %v1705_v55 = vmax.f32 %v1336_v62, 0.0 }
  0xc1   : > { %652 = vst [vmem:[%s1499_s5 + $0x40] sm:$0xff] %v620_v27  ;;  %653 = vst [vmem:[%s1499_s5 + $0x48] sm:$0xff] %v621_v44  ;;  %v570_v12 = vpop.permute.xlu1 %569  ;;  %v565_v33 = vpop.permute.xlu0 %564  ;;  %v510_v58 = vmul.f32 %v1473_v54, %v1704_v29  ;;  %v1706_v16 = vmax.f32 %v1340_v0, 0.0  ;;  %v1707_v26 = vmax.f32 %v1343_v1, 0.0  ;;  %v1708_v1 = vmax.f32 %v1378_v7, 0.0 }
  0xc2   : > { %v626_v17 = vadd.f32 %v570_v12, %v498_v61  ;;  %v627_v13 = vadd.f32 %v570_v12, %v499_v63  ;;  %v624_v36 = vadd.f32 %v565_v33, %v496_v6  ;;  %v625_v15 = vadd.f32 %v565_v33, %v497_v3 }
  0xc3   : > { %v511_v23 = vmul.f32 %v1473_v54, %v1705_v55  ;;  %v508_v22 = vmul.f32 %v1475_v51, %v1706_v16  ;;  %v509_v43 = vmul.f32 %v1475_v51, %v1707_v26  ;;  %v514_v51 = vmul.f32 %v1477_v49, %v1708_v1 }
  0xc4   : > { %658 = vst [vmem:[%s1499_s5 + $0x70] sm:$0xff] %v626_v17  ;;  %659 = vst [vmem:[%s1499_s5 + $0x78] sm:$0xff] %v627_v13  ;;  %v515_v61 = vmul.f32 %v1477_v49, %v1709_v31  ;;  %v1710_v32 = vmax.f32 %v1384_v14, 0.0  ;;  %v513_v6 = vmul.f32 %v1479_v48, %v1711_v5 }
  0xc5   : > { %656 = vst [vmem:[%s1499_s5 + $0x60] sm:$0xff] %v624_v36  ;;  %657 = vst [vmem:[%s1499_s5 + $0x68] sm:$0xff] %v625_v15  ;;  %v580_v45 = vpop.permute.xlu1 %579  ;;  %v575_v11 = vpop.permute.xlu0 %574 }
  0xc6   : > { %v630_v46 = vadd.f32 %v580_v45, %v502_v18  ;;  %v631_v4 = vadd.f32 %v580_v45, %v503_v21  ;;  %v628_v19 = vadd.f32 %v575_v11, %v500_v25  ;;  %v629_v47 = vadd.f32 %v575_v11, %v501_v10 }
  0xc7   : > { %v512_v63 = vmul.f32 %v1479_v48, %v1710_v32 }
  0xc8   : > { %662 = vst [vmem:[%s1499_s5 + $0x90] sm:$0xff] %v630_v46  ;;  %663 = vst [vmem:[%s1499_s5 + $0x98] sm:$0xff] %v631_v4 }
  0xc9   : > { %660 = vst [vmem:[%s1499_s5 + $0x80] sm:$0xff] %v628_v19  ;;  %661 = vst [vmem:[%s1499_s5 + $0x88] sm:$0xff] %v629_v47  ;;  %v590_v52 = vpop.permute.xlu1 %589  ;;  %v585_v53 = vpop.permute.xlu0 %584 }
  0xca   : > { %v634_v42 = vadd.f32 %v590_v52, %v506_v50  ;;  %v635_v56 = vadd.f32 %v590_v52, %v507_v60  ;;  %v632_v30 = vadd.f32 %v585_v53, %v504_v34  ;;  %v633_v57 = vadd.f32 %v585_v53, %v505_v37 }
  0xcc   : > { %666 = vst [vmem:[%s1499_s5 + $0xb0] sm:$0xff] %v634_v42  ;;  %667 = vst [vmem:[%s1499_s5 + $0xb8] sm:$0xff] %v635_v56 }
  0xcd   : > { %664 = vst [vmem:[%s1499_s5 + $0xa0] sm:$0xff] %v632_v30  ;;  %665 = vst [vmem:[%s1499_s5 + $0xa8] sm:$0xff] %v633_v57  ;;  %v600_v59 = vpop.permute.xlu1 %599  ;;  %v595_v62 = vpop.permute.xlu0 %594 }
  0xce   : > { %v638_v27 = vadd.f32 %v600_v59, %v510_v58  ;;  %v639_v54 = vadd.f32 %v600_v59, %v511_v23  ;;  %v636_v44 = vadd.f32 %v595_v62, %v508_v22  ;;  %v637_v0 = vadd.f32 %v595_v62, %v509_v43 }
  0xd0   : > { %670 = vst [vmem:[%s1499_s5 + $0xd0] sm:$0xff] %v638_v27  ;;  %671 = vst [vmem:[%s1499_s5 + $0xd8] sm:$0xff] %v639_v54 }
  0xd1   : > { %668 = vst [vmem:[%s1499_s5 + $0xc0] sm:$0xff] %v636_v44  ;;  %669 = vst [vmem:[%s1499_s5 + $0xc8] sm:$0xff] %v637_v0  ;;  %v610_v7 = vpop.permute.xlu1 %609  ;;  %v605_v8 = vpop.permute.xlu0 %604 }
  0xd2   : > { %v642_v49 = vadd.f32 %v610_v7, %v514_v51  ;;  %v643_v2 = vadd.f32 %v610_v7, %v515_v61  ;;  %v640_v14 = vadd.f32 %v605_v8, %v512_v63  ;;  %v641_v3 = vadd.f32 %v605_v8, %v513_v6 }
  0xd4   : > { %674 = vst [vmem:[%s1499_s5 + $0xf0] sm:$0xff] %v642_v49  ;;  %675 = vst [vmem:[%s1499_s5 + $0xf8] sm:$0xff] %v643_v2 }
  0xd5   : > { %672 = vst [vmem:[%s1499_s5 + $0xe0] sm:$0xff] %v640_v14  ;;  %673 = vst [vmem:[%s1499_s5 + $0xe8] sm:$0xff] %v641_v3 }
  0xd6   : > { %988 = shalt.err (!%p985_p7)
}
  0xd7   : > { %s989_s22 = scalar_lea.hbm %s1597_s11, 4096  ;;  %s993_s29 = scalar_lea.hbm %s1654_s3, 8192 }
  0xd8   : > { %p990_p9 = scmp.ne.s32.totalorder %s1597_s11, %s989_s22  ;;  %p994_p12 = scmp.lt.s32.totalorder %s1597_s11, %s1654_s3 }
  0xd9   : > { %p995_p13 = scmp.lt.s32.totalorder %s993_s29, %s989_s22 }
  0xda   : > { %p991_p10 = pnand %p990_p9, %p1127_p4 }
  0xdb   : > { %p996_p0 = por %p995_p13, %p994_p12 }
  0xdc   : > { %p992_p11 = pneg %p991_p10 }
  0xde   : > { %p997_p1 = pnand %p996_p0, %p992_p11 }
  0xe0   : > { %1000 = shalt.err (!%p997_p1)
}
  0xe1   : > { %884 = dma.vmem_to_hbm [thread:$0]  (%p1127_p4), %s1599_s13, 4096, %s1597_s11, %s677_s12, %s1059_s8, %s1059_s8, %s1060_s10  }
  0xe2 PF: > { %p895_p2 = scmp.ge.s32.totalorder %s1055_s20, 2  ;;  %s732_s6 = sand.u32 1, %s1035_s15  }
  0xe3   : > { %s733_s7 = scalar_lea.sflag [#allocation3], %s732_s6 }
  0xe4   : > { %p889_p3 = pnand %p895_p2, %p1134_p8 }
  0xe6   : > { %p890_p5 = pneg %p889_p3 }
  0xe8   : > { %1026 = dma.done.wait (%p890_p5), %s733_s7, 4096  }
  0xe9   : > { %1028 = vsyncadd (%p890_p5), %s733_s7, 4294963200  ;;  %s742_s14 = scalar_lea.sflag [#allocation5], %s732_s6 }
  0xea   : > { %1030 = dma.done.wait (%p890_p5), %s742_s14, 4096  }
  0xeb   : > { %1032 = vsyncadd (%p890_p5), %s742_s14, 4294963200  ;;  %s21_s20 = sadd.s32 1, %s1055_s20   ;;  %s1712_s15 = smov %s1039_s16 }
  0xec   : > { %p18_p6 = scmp.ge.s32.totalorder %s21_s20, 4   ;;  %s1713_s16 = smov %s1043_s17 }
  0xed   : > { %s1714_s17 = smov %s1140_s28  ;;  %s1715_s18 = smov %s1051_s19 }
  0xee   : > { %s1716_s19 = smov %s1718_s23  ;;  %20 = sbr.rel (!%p18_p6) target bundleno = 6 (0x6), region = 90 }
  0xf3   :  { %747 = vsyncpa [#allocation3], 1 }
  0xf4   :  { %749 = vsyncpa [#allocation3 + $0x1], 1 }
  0xf5   :  { %750 = vsyncpa [#allocation5], 1 }
  0xf6   :  { %752 = vsyncpa [#allocation5 + $0x1], 1 }

</bundles_post_ra>
